<compile_context>
chip_gen: v7x
topology: tpu7x:2x2x1
jax: 0.10.0
libtpu: 0.0.40
codegen_flags: <defaults>
</compile_context>

<pallas_src>
import functools

import jax
import jax.numpy as jnp
import numpy as np
from jax.experimental import pallas as pl
from jax.experimental.pallas import tpu as pltpu


def _round_up(x, q):
    return ((x + q - 1) // q) * q


def _pick_block(dim, cap, quantum):
    """Largest multiple of `quantum` <= cap, preferring one that divides `dim`."""
    cap_q = max(quantum, (cap // quantum) * quantum)
    for b in range(cap_q, quantum - 1, -quantum):
        if dim % b == 0:
            return b
    return cap_q  # no exact divisor: last block is partial (Pallas masks it)


def _plan_tiles(nc, hw, itemsize, tile_bytes):
    """Pick (row_block, lane_block) for a (nc, hw) slab under a byte budget."""
    LANE_Q, ROW_Q = 128, 8
    # Lane (last-dim) chunk: big multiple of 128 (lane-dense stores), capped so
    # a tile of at least ROW_Q rows fits the byte budget.
    lw_cap = max(LANE_Q, tile_bytes // (ROW_Q * itemsize))
    lw_cap = min(lw_cap, 8192)
    lw = hw if hw <= lw_cap else _pick_block(hw, lw_cap, LANE_Q)
    # Row chunk from the remaining byte budget.
    bm_cap = max(ROW_Q, tile_bytes // (lw * itemsize))
    bm = nc if nc <= bm_cap else _pick_block(nc, bm_cap, ROW_Q)
    return bm, lw


def _random_apply_kernel(x_ref, scale_ref, shift_ref, o_ref, *, block_rows):
    # x_ref / o_ref: (BM, LW) tile of the (NC, HW) slab.
    # scale_ref / shift_ref: full (NC, 1) columns, VMEM-resident (constant
    # index_map) — slice this tile's rows and broadcast along lanes.
    if block_rows == scale_ref.shape[0]:
        s = scale_ref[...]
        b = shift_ref[...]
    else:
        # block_rows is a multiple of 8 by construction in this branch.
        row0 = pl.multiple_of(pl.program_id(0) * block_rows, 8)
        s = scale_ref[pl.ds(row0, block_rows), :]
        b = shift_ref[pl.ds(row0, block_rows), :]
    o_ref[...] = (x_ref[...] * s + b).astype(o_ref.dtype)


def random_apply(x, scale_c, shift_c, *, p, key, tile_bytes=4 * 1024 * 1024):
    """Prototype RandomApply(per-channel affine, p) on an NCHW float tensor.

    With probability p the input is returned unchanged; otherwise the affine
    y = x * scale_c[c] + shift_c[c] is applied.  `key` must be fresh per call.
    """
    N, C, H, W = x.shape
    NC, HW = N * C, H * W

    # Single scalar draw (torch.rand(())); prototype semantics: u < p => unchanged.
    u = jax.random.uniform(key, (), dtype=jnp.float32)
    unchanged = u < jnp.float32(p)

    # Fold the branch decision into tiny (C,)-sized effective parameters.
    eff_scale = jnp.where(unchanged, jnp.float32(1.0), scale_c.astype(jnp.float32))
    eff_shift = jnp.where(unchanged, jnp.float32(0.0), shift_c.astype(jnp.float32))

    # Per-row (row = n*C + c) parameter columns, shape (NC, 1), kept f32.
    scale_col = jnp.tile(eff_scale, (N,)).reshape(NC, 1)
    shift_col = jnp.tile(eff_shift, (N,)).reshape(NC, 1)

    x2 = x.reshape(NC, HW)
    itemsize = x2.dtype.itemsize
    BM, LW = _plan_tiles(NC, HW, itemsize, tile_bytes)

    # VMEM budget: 2 double-buffered streams (in + out) + 2 resident padded
    # param columns + margin; clamp to <= 48 MiB (v7x: 64 MiB physical per TC;
    # v5e/v6e default scoped limits are 16/32 MiB, so raise explicitly).
    tile_b = BM * LW * itemsize
    col_b = _round_up(NC, 8) * 128 * 4
    vmem_limit = int(min(max(4 * tile_b + 4 * col_b + (2 << 20), 32 << 20),
                         48 << 20))

    grid = (pl.cdiv(NC, BM), pl.cdiv(HW, LW))

    out2 = pl.pallas_call(
        functools.partial(_random_apply_kernel, block_rows=BM),
        out_shape=jax.ShapeDtypeStruct((NC, HW), x2.dtype),
        grid=grid,
        in_specs=[
            pl.BlockSpec((BM, LW), lambda i, j: (i, j)),   # x tile
            pl.BlockSpec((NC, 1), lambda i, j: (0, 0)),    # resident scale col
            pl.BlockSpec((NC, 1), lambda i, j: (0, 0)),    # resident shift col
        ],
        out_specs=pl.BlockSpec((BM, LW), lambda i, j: (i, j)),
        compiler_params=pltpu.CompilerParams(
            dimension_semantics=("parallel", "parallel"),
            vmem_limit_bytes=vmem_limit),
    )(x2, scale_col, shift_col)

    return out2.reshape(N, C, H, W)


if __name__ == "__main__":
    root = jax.random.PRNGKey(0)
    data_key, draw_key, draw_key2 = jax.random.split(root, 3)

    # --- Case 1: module-consistent small shape (N=2, C=4, H=W=16) -----------
    N, C, H, W = 2, 4, 16, 16
    x = jax.random.normal(data_key, (N, C, H, W), dtype=jnp.float32)
    scale_c = 1.0 + 0.1 * jnp.arange(C, dtype=jnp.float32)
    shift_c = 0.01 * jnp.arange(C, dtype=jnp.float32)
    x_np = np.asarray(x)
    transformed_ref = np.asarray(
        x * scale_c.reshape(1, C, 1, 1) + shift_c.reshape(1, C, 1, 1))

    p = 0.5
    out = random_apply(x, scale_c, shift_c, p=p, key=draw_key)
    jax.block_until_ready(out)
    u = float(jax.random.uniform(draw_key, (), dtype=jnp.float32))
    expected = x_np if u < p else transformed_ref   # prototype branch sense
    assert np.allclose(np.asarray(out), expected, rtol=1e-5, atol=1e-5), \
        "output does not match the selected RandomApply branch"

    # Force each branch deterministically: u in [0,1), so p=1.0 -> always
    # unchanged, p=0.0 -> always transformed.
    out_id = random_apply(x, scale_c, shift_c, p=1.0, key=draw_key2)
    out_tf = random_apply(x, scale_c, shift_c, p=0.0, key=draw_key2)
    jax.block_until_ready((out_id, out_tf))
    assert np.allclose(np.asarray(out_id), x_np, rtol=1e-6, atol=1e-6), \
        "identity branch mismatch"
    assert np.allclose(np.asarray(out_tf), transformed_ref, rtol=1e-5, atol=1e-5), \
        "transformed branch mismatch"

    # --- Case 2: exercise the 2-D grid + resident-column row slicing --------
    N2, C2, H2, W2 = 4, 8, 32, 32
    xb = jax.random.normal(data_key, (N2, C2, H2, W2), dtype=jnp.float32)
    scale2 = 1.0 + 0.05 * jnp.arange(C2, dtype=jnp.float32)
    shift2 = 0.02 * jnp.arange(C2, dtype=jnp.float32)
    # Tiny tile budget forces BM < NC and LW < HW (grid = (4, 2)).
    out_b = random_apply(xb, scale2, shift2, p=0.0, key=draw_key,
                         tile_bytes=16 * 1024)
    jax.block_until_ready(out_b)
    exp_b = np.asarray(
        xb * scale2.reshape(1, C2, 1, 1) + shift2.reshape(1, C2, 1, 1))
    assert np.allclose(np.asarray(out_b), exp_b, rtol=1e-5, atol=1e-5), \
        "tiled-grid transformed branch mismatch"

    print("KERNEL_OK")
</pallas_src>

<mosaic_0001>
module attributes {stable_mosaic.version = 11 : i64} {
  func.func @_random_apply_kernel(%arg0: i32, %arg1: i32, %arg2: memref<8x256xf32, #tpu.memory_space<vmem>>, %arg3: memref<8x1xf32, #tpu.memory_space<vmem>>, %arg4: memref<8x1xf32, #tpu.memory_space<vmem>>, %arg5: memref<8x256xf32, #tpu.memory_space<vmem>>) attributes {dimension_semantics = [#tpu.dimension_semantics<parallel>, #tpu.dimension_semantics<parallel>], iteration_bounds = array<i64: 1, 1>, scalar_prefetch = 0 : i64, scratch_operands = 0 : i64, tpu.core_type = #tpu.core_type<tc>, window_params = [{transform_indices = @transform_0, window_bounds = array<i64: 8, 256>}, {pipeline_mode = #tpu.pipeline_mode<synchronous>, transform_indices = @transform_1, window_bounds = array<i64: 8, 1>}, {pipeline_mode = #tpu.pipeline_mode<synchronous>, transform_indices = @transform_2, window_bounds = array<i64: 8, 1>}, {transform_indices = @transform_3, window_bounds = array<i64: 8, 256>}]} {
    %c0 = arith.constant 0 : index
    %c0_0 = arith.constant 0 : index
    %0 = vector.load %arg3[%c0, %c0_0] : memref<8x1xf32, #tpu.memory_space<vmem>>, vector<8x1xf32>
    %c0_1 = arith.constant 0 : index
    %c0_2 = arith.constant 0 : index
    %1 = vector.load %arg4[%c0_1, %c0_2] : memref<8x1xf32, #tpu.memory_space<vmem>>, vector<8x1xf32>
    %c0_3 = arith.constant 0 : index
    %c0_4 = arith.constant 0 : index
    %2 = vector.load %arg2[%c0_3, %c0_4] : memref<8x256xf32, #tpu.memory_space<vmem>>, vector<8x256xf32>
    %3 = vector.broadcast %0 : vector<8x1xf32> to vector<8x256xf32>
    %4 = arith.mulf %2, %3 : vector<8x256xf32>
    %5 = vector.broadcast %1 : vector<8x1xf32> to vector<8x256xf32>
    %6 = arith.addf %4, %5 : vector<8x256xf32>
    %c0_5 = arith.constant 0 : index
    %c0_6 = arith.constant 0 : index
    %7 = vector.load %arg5[%c0_5, %c0_6] : memref<8x256xf32, #tpu.memory_space<vmem>>, vector<8x256xf32>
    tpu.vector_store %arg5[%c0_5, %c0_6], %6 {strides = array<i32>} : memref<8x256xf32, #tpu.memory_space<vmem>>, vector<8x256xf32>,
    return
  }
  func.func @transform_0(%arg0: i32, %arg1: i32) -> (i32, i32) {
    %c0_i32 = arith.constant 0 : i32
    return %arg0, %arg1 : i32, i32
  }
  func.func @transform_1(%arg0: i32, %arg1: i32) -> (i32, i32) {
    %c0_i32 = arith.constant 0 : i32
    %c0_i32_0 = arith.constant 0 : i32
    %c0_i32_1 = arith.constant 0 : i32
    return %c0_i32, %c0_i32_0 : i32, i32
  }
  func.func @transform_2(%arg0: i32, %arg1: i32) -> (i32, i32) {
    %c0_i32 = arith.constant 0 : i32
    %c0_i32_0 = arith.constant 0 : i32
    %c0_i32_1 = arith.constant 0 : i32
    return %c0_i32, %c0_i32_0 : i32, i32
  }
  func.func @transform_3(%arg0: i32, %arg1: i32) -> (i32, i32) {
    %c0_i32 = arith.constant 0 : i32
    return %arg0, %arg1 : i32, i32
  }
}

</mosaic_0001>

<bundles_post_ra>
// kernel: tpu_custom_call.1
= control target key start
LH: loop header
LB: loop body
LE: loop exit
PB: predicated region body
PF: predicated region fallthrough
CT: control target
= control target key end

     0   :  { %v76_v1 = vmov 0   ;;  %s122_s0 = inlined_call_operand.vmem [shape: f32[8,256], index: 0, kind: input, shape index: {}]   ;;  %s123_s1 = inlined_call_operand.vmem [shape: f32[8,1], index: 1, kind: input, shape index: {}]   ;;  %s124_s2 = inlined_call_operand.vmem [shape: f32[8,1], index: 2, kind: input, shape index: {}]   ;;  %s125_s3 = inlined_call_operand.hbm [shape: f32[8,256], index: 3, kind: output, shape index: {}]  }
   0x1   :  { %v15_v0 = vld [vmem:[%s123_s1] sm:$0xff]  ;;  %51 = vset.pattern.permute.xlu0 %v76_v1 }
   0x2   :  { %8 = vsyncpa [#allocation3], 0  ;;  %21 = vperm.xlu0 %51, %v15_v0   ;;  %v16_v2 = vld [vmem:[%s124_s2] sm:$0xff]  ;;  %v18_v4 = vld [vmem:[%s122_s0 + $0x8] sm:$0xff]  ;;  %s77_s20 = smov [#allocation2]  }
   0x3   :  { %v17_v3 = vld [vmem:[%s122_s0] sm:$0xff]  ;;  %s41_s1 = sshll.u32 %s77_s20, 4  ;;  %s42_s1 = int_to_ptr.vmem [resolvable:$true] %s41_s1 }
   0x4   :  { %s52_s2 = scalar_lea.vmem %s42_s1, 256  ;;  %p57_p1 = scmp.lt.s32.totalorder %s42_s1, %s42_s1 }
   0x5   :  { %p53_p0 = scmp.ne.s32.totalorder %s42_s1, %s52_s2  ;;  %p58_p2 = scmp.lt.s32.totalorder %s52_s2, %s52_s2 }
   0x6   :  { %28 = vperm.xlu0 %51, %v16_v2  }
   0x7   :  { %p59_p3 = por %p58_p2, %p57_p1 }
   0x9   :  { %p60_p4 = pnand %p59_p3, %p53_p0 }
  0x81   :  { %v22_v5 = vpop.permute.xlu0 %21 }
  0x82   :  { %v24_v6 = vmul.f32 %v22_v5, %v17_v3  ;;  %v25_v7 = vmul.f32 %v22_v5, %v18_v4 }
  0x85   :  { %v29_v8 = vpop.permute.xlu0 %28 }
  0x86   :  { %v31_v9 = vadd.f32 %v29_v8, %v24_v6  ;;  %v32_v10 = vadd.f32 %v29_v8, %v25_v7 }
  0x88   :  { %33 = vst [vmem:[#allocation2] sm:$0xff] %v31_v9  ;;  %34 = vst [vmem:[#allocation2 + $0x8] sm:$0xff] %v32_v10 }
  0x89   :  { %63 = shalt.err (!%p60_p4)
}
  0x8a   :  { %s64_s22 = scalar_lea.hbm %s125_s3, 256 }
  0x8b   :  { %p65_p5 = scmp.ne.s32.totalorder %s125_s3, %s64_s22  ;;  %p68_p6 = scmp.lt.u32.totalorder %s64_s22, %s125_s3 }
  0x8d   :  { %p70_p7 = pnand %p68_p6, %p65_p5 }
  0x8f   :  { %73 = shalt.err (!%p70_p7)
}
  0x90   :  { %44 = dma.vmem_to_hbm [thread:$0]  %s42_s1, 256, %s125_s3, [#allocation3]  }
  0x91   :  { %74 = dma.done.wait [#allocation3], 256  }
  0x92   :  { %75 = vsyncadd [#allocation3], 4294967040 }
  0x93   :  { %48 = vsyncpa [#allocation3], 1 }

</bundles_post_ra>
